<compile_context>
chip_gen: v7x
topology: tpu7x:2x2x1
jax: 0.10.0
libtpu: 0.0.40
codegen_flags: <defaults>
</compile_context>

<pallas_src>
import math

import jax
import jax.numpy as jnp
from jax.experimental import pallas as pl
from jax.experimental.pallas import tpu as pltpu


def _round_up(x, m):
    return ((x + m - 1) // m) * m


def _choose_tile_b(B, max_tile=2048):
    """Large tiles for HBM roofline; >=2 grid steps when possible (v7x megacore)."""
    if B <= 8:
        return B  # full-array-dim exception on the sublane axis
    tile = _round_up(pl.cdiv(B, 2), 8)
    return min(tile, max_tile)


def _linnet_kernel(x_ref, w_ref, o_ref):
    # One MXU matmul per B-tile; f32 accumulation regardless of input dtype.
    o_ref[...] = jnp.dot(
        x_ref[...], w_ref[...], preferred_element_type=jnp.float32
    ).astype(o_ref.dtype)


def prepare_weight(w):
    """w: (O, F) in torch nn.Linear layout -> (F, O) pre-transposed (no padding)."""
    return jnp.transpose(w)


@jax.jit
def linnet_forward(x, w_t):
    """x: (B, F), w_t: (F, O) = W^T  ->  (B, O) float32 (== x @ W^T)."""
    B, F = x.shape
    F2, O = w_t.shape
    assert F == F2

    tile_b = _choose_tile_b(B)
    grid_b = pl.cdiv(B, tile_b)

    itemsize_x = jnp.dtype(x.dtype).itemsize
    itemsize_w = jnp.dtype(w_t.dtype).itemsize
    cost = pl.CostEstimate(
        flops=2 * grid_b * tile_b * F * O,
        transcendentals=0,
        bytes_accessed=(
            itemsize_x * grid_b * tile_b * F  # x read (incl. boundary pad)
            + itemsize_w * F * O              # weight read once
            + 4 * grid_b * tile_b * O         # f32 output write
        ),
    )

    return pl.pallas_call(
        _linnet_kernel,
        out_shape=jax.ShapeDtypeStruct((B, O), jnp.float32),
        grid_spec=pl.GridSpec(
            grid=(grid_b,),
            in_specs=[
                # Last dims (F and O) equal the full array dims, so the
                # (8,128) divisibility rule is satisfied without lane padding.
                pl.BlockSpec((tile_b, F), lambda i: (i, 0)),
                pl.BlockSpec((F, O), lambda i: (0, 0)),  # whole weight, VMEM-resident
            ],
            out_specs=pl.BlockSpec((tile_b, O), lambda i: (i, 0)),
        ),
        compiler_params=pltpu.CompilerParams(
            # Single independent B axis -> shardable across v7x's 2 TensorCores.
            dimension_semantics=("parallel",),
        ),
        cost_estimate=cost,
    )(x, w_t)


def xavier_uniform(key, shape, dtype=jnp.float32):
    """Matches torch.nn.init.xavier_uniform_ for a 2-D weight (fan_out, fan_in)."""
    fan_out, fan_in = shape
    limit = math.sqrt(6.0 / (fan_in + fan_out))
    return jax.random.uniform(key, shape, dtype=dtype, minval=-limit, maxval=limit)


if __name__ == "__main__":
    # Shapes consistent with the module; batch large enough that the 1-D grid
    # has 2 parallel steps (tile_b = 128) while staying tiny overall.
    batch = 256
    n_features = 32
    n_actions = 4
    n_quantiles = 8
    n_out = n_actions * n_quantiles

    key = jax.random.PRNGKey(0)
    k_w, k_x = jax.random.split(key)

    # PyTorch Linear weight shape is (out_features, in_features); xavier_uniform init.
    w = xavier_uniform(k_w, (n_out, n_features))   # (A*Q, F)
    w_t = prepare_weight(w)                        # (F, A*Q), transposed once

    x = jax.random.normal(k_x, (batch, n_features), dtype=jnp.float32)

    y = linnet_forward(x, w_t)
    jax.block_until_ready(y)

    # Pure-JAX reference check (same semantics as torch: x @ W^T).
    y_ref = x @ w.T
    assert y.shape == (batch, n_out)
    assert jnp.allclose(y, y_ref, atol=1e-5, rtol=1e-5), "mismatch vs reference"

    print("KERNEL_OK")
</pallas_src>

<mosaic_0001>
module attributes {stable_mosaic.version = 11 : i64} {
  func.func @_linnet_kernel(%arg0: i32, %arg1: memref<128x32xf32, #tpu.memory_space<vmem>>, %arg2: memref<32x32xf32, #tpu.memory_space<vmem>>, %arg3: memref<128x32xf32, #tpu.memory_space<vmem>>) attributes {dimension_semantics = [#tpu.dimension_semantics<parallel>], iteration_bounds = array<i64: 2>, scalar_prefetch = 0 : i64, scratch_operands = 0 : i64, tpu.core_type = #tpu.core_type<tc>, window_params = [{transform_indices = @transform_0, window_bounds = array<i64: 128, 32>}, {pipeline_mode = #tpu.pipeline_mode<synchronous>, transform_indices = @transform_1, window_bounds = array<i64: 32, 32>}, {transform_indices = @transform_2, window_bounds = array<i64: 128, 32>}]} {
    %c0 = arith.constant 0 : index
    %c0_0 = arith.constant 0 : index
    %0 = vector.load %arg1[%c0, %c0_0] : memref<128x32xf32, #tpu.memory_space<vmem>>, vector<128x32xf32>
    %c0_1 = arith.constant 0 : index
    %c0_2 = arith.constant 0 : index
    %1 = vector.load %arg2[%c0_1, %c0_2] : memref<32x32xf32, #tpu.memory_space<vmem>>, vector<32x32xf32>
    %cst = arith.constant dense<0.000000e+00> : vector<128x32xf32>
    %2 = tpu.matmul %0, %1, %cst {dimension_numbers = #tpu.dot_dimension_numbers<[1], [0], [0], [1], [0, 0, 1, 1], [], []>} : vector<128x32xf32>, vector<32x32xf32>, vector<128x32xf32> -> vector<128x32xf32>
    %c0_3 = arith.constant 0 : index
    %c0_4 = arith.constant 0 : index
    %3 = vector.load %arg3[%c0_3, %c0_4] : memref<128x32xf32, #tpu.memory_space<vmem>>, vector<128x32xf32>
    tpu.vector_store %arg3[%c0_3, %c0_4], %2 {strides = array<i32>} : memref<128x32xf32, #tpu.memory_space<vmem>>, vector<128x32xf32>,
    return
  }
  func.func @transform_0(%arg0: i32) -> (i32, i32) {
    %c0_i32 = arith.constant 0 : i32
    %c0_i32_0 = arith.constant 0 : i32
    return %arg0, %c0_i32 : i32, i32
  }
  func.func @transform_1(%arg0: i32) -> (i32, i32) {
    %c0_i32 = arith.constant 0 : i32
    %c0_i32_0 = arith.constant 0 : i32
    %c0_i32_1 = arith.constant 0 : i32
    return %c0_i32, %c0_i32_0 : i32, i32
  }
  func.func @transform_2(%arg0: i32) -> (i32, i32) {
    %c0_i32 = arith.constant 0 : i32
    %c0_i32_0 = arith.constant 0 : i32
    return %arg0, %c0_i32 : i32, i32
  }
}

</mosaic_0001>

<bundles_post_ra>
// kernel: linnet_forward.1
= control target key start
LH: loop header
LB: loop body
LE: loop exit
PB: predicated region body
PF: predicated region fallthrough
CT: control target
= control target key end

     0   :  { %s555_s9 = smov 0   ;;  %s659_s0 = inlined_call_operand.vmem [shape: f32[256,32], index: 0, kind: input, shape index: {}]   ;;  %s660_s1 = inlined_call_operand.vmem [shape: f32[32,32], index: 1, kind: input, shape index: {}]   ;;  %s661_s2 = inlined_call_operand.vmem [shape: f32[256,32], index: 2, kind: output, shape index: {}]  }
   0x1 LB: > { %s433_s10 = sadd.s32 4294967295, %s538_s9   ;;  %p437_p0 = scmp.ge.s32.totalorder %s538_s9, 1  ;;  %s538_s9 = sphi %s555_s9, %s12_s9  }
   0x2   : > { %p113_p1 = scmp.lt.s32.totalorder %s538_s9, 3 }
   0x4   : > { %p114_p2 = pnand %p437_p0, %p113_p1 }
   0x5   : > { %v163_v0 = vld [vmem:[%s660_s1] sm:$0xff] (!%p114_p2)  ;;  %v164_v1 = vld [vmem:[%s660_s1 + $0x8] sm:$0xff] (!%p114_p2)  ;;  %v165_v2 = vld [vmem:[%s660_s1 + $0x10] sm:$0xff] (!%p114_p2)  ;;  %s438_s17 = sshll.u32 (!%p114_p2), %s433_s10, 4  ;;  %vm167_vm0 = vcmask (!%p114_p2), 261120  }
   0x6   : > { %117 = sbr.rel (%p114_p2) target bundleno = 245 (0xf5), region = 28  ;;  %v512_v3 = vpack.c.bf16 (!%p114_p2), %v164_v1, %v163_v0  ;;  %v166_v4 = vld [vmem:[%s660_s1 + $0x18] sm:$0xff] (!%p114_p2)  ;;  %p136_p3 = scmp.lt.s32.totalorder (!%p114_p2), %s438_s17, 31 }
   0x7   : > { %v516_v5 = vpack.c.bf16 (!%p114_p2), %v166_v4, %v165_v2 }
   0x8   : > { %513 = vmatprep.subr.bf16.mxu0 (!%p114_p2), %v512_v3  ;;  %520 = vmatprep.subr.bf16.mxu1 (!%p114_p2), %v512_v3 }
   0x9   : > { %515 = vmatpush3.bf16.msra.mxu0 (!%p114_p2), %v512_v3  ;;  %522 = vmatpush3.bf16.msra.mxu1 (!%p114_p2), %v512_v3 }
   0xa   : > { %517 = vmatprep.subr.bf16.mxu0 (!%p114_p2), %v516_v5  ;;  %521 = vmatprep.subr.bf16.mxu1 (!%p114_p2), %v516_v5 }
   0xd   : > { %s663_s17 = smov (!%p136_p3, %s438_s17), 31  ;;  %519 = vmatpush3.bf16.msra.mxu0 %v516_v5  ;;  %523 = vmatpush3.bf16.msra.mxu1 %v516_v5 }
   0xe   : > { %s439_s20 = sshll.u32 %s663_s17, 3 }
   0xf   : > { %s583_s23 = scalar_lea.vmem %s659_s0, %s439_s20  ;;  %s622_s26 = scalar_lea.vmem %s661_s2, %s439_s20 }
  0x10   : > { %v147_v6 = vld [vmem:[%s583_s23] sm:$0xff]  ;;  %v148_v8 = vld [vmem:[%s583_s23 + $0x8] sm:$0xff]  ;;  %v149_v10 = vld [vmem:[%s583_s23 + $0x10] sm:$0xff] }
  0x11   : > { %v155_v7 = vld [vmem:[%s583_s23 + $0x40] sm:$0xff]  ;;  %v156_v9 = vld [vmem:[%s583_s23 + $0x48] sm:$0xff]  ;;  %488 = vmatprep.mubr.msk.f32.mxu0 %vm167_vm0, %v147_v6  ;;  %v157_v11 = vld [vmem:[%s583_s23 + $0x50] sm:$0xff] }
  0x12   : > { %500 = vmatprep.mubr.msk.f32.mxu1 %vm167_vm0, %v155_v7  ;;  %489 = vmatmul.mubr.msk.f32.vlgmr.msra.gmra.mrb[0].mxu0 %vm167_vm0, %v148_v8  ;;  %v150_v12 = vld [vmem:[%s583_s23 + $0x18] sm:$0xff]  ;;  %v151_v14 = vld [vmem:[%s583_s23 + $0x20] sm:$0xff]  ;;  %v152_v16 = vld [vmem:[%s583_s23 + $0x28] sm:$0xff] }
  0x13   : > { %501 = vmatmul.mubr.msk.f32.vlgmr.msra.gmra.mrb[0].mxu1 %vm167_vm0, %v156_v9  ;;  %491 = vmatprep.mubr.msk.f32.mxu0 %vm167_vm0, %v149_v10  ;;  %v158_v13 = vld [vmem:[%s583_s23 + $0x58] sm:$0xff]  ;;  %v159_v15 = vld [vmem:[%s583_s23 + $0x60] sm:$0xff]  ;;  %v160_v17 = vld [vmem:[%s583_s23 + $0x68] sm:$0xff] }
  0x14   : > { %503 = vmatprep.mubr.msk.f32.mxu1 %vm167_vm0, %v157_v11  ;;  %v153_v18 = vld [vmem:[%s583_s23 + $0x30] sm:$0xff]  ;;  %v154_v20 = vld [vmem:[%s583_s23 + $0x38] sm:$0xff] }
  0x15   : > { %v161_v19 = vld [vmem:[%s583_s23 + $0x70] sm:$0xff]  ;;  %v162_v21 = vld [vmem:[%s583_s23 + $0x78] sm:$0xff] }
  0x16   : > { %492 = vmatmul.mubr.msk.f32.gmra.mrb[2].mxu0 %vm167_vm0, %v150_v12 }
  0x17   : > { %504 = vmatmul.mubr.msk.f32.gmra.mrb[2].mxu1 %vm167_vm0, %v158_v13  ;;  %494 = vmatprep.mubr.msk.f32.mxu0 %vm167_vm0, %v151_v14 }
  0x18   : > { %506 = vmatprep.mubr.msk.f32.mxu1 %vm167_vm0, %v159_v15 }
  0x1a   : > { %495 = vmatmul.mubr.msk.f32.gmra.mrb[4].mxu0 %vm167_vm0, %v152_v16 }
  0x1b   : > { %507 = vmatmul.mubr.msk.f32.gmra.mrb[4].mxu1 %vm167_vm0, %v160_v17  ;;  %497 = vmatprep.mubr.msk.f32.mxu0 %vm167_vm0, %v153_v18 }
  0x1c   : > { %509 = vmatprep.mubr.msk.f32.mxu1 %vm167_vm0, %v161_v19 }
  0x1e   : > { %498 = vmatmul.mubr.msk.f32.gmra.mrb[6].mxu0 %vm167_vm0, %v154_v20 }
  0x1f   : > { %510 = vmatmul.mubr.msk.f32.gmra.mrb[6].mxu1 %vm167_vm0, %v162_v21 }
  0xe5   : > { %v490_v22 = vpop.f32.mrb[0].mxu0 }
  0xe6   : > { %v502_v23 = vpop.f32.mrb[0].mxu1  ;;  %362 = vst.msk [vmem:[%s622_s26 + $0x8] sm:$0xff] %vm167_vm0, %v490_v22  ;;  %v282_v24 = vpop.f32.mrb[1].mxu0 }
  0xe7   : > { %370 = vst.msk [vmem:[%s622_s26 + $0x48] sm:$0xff] %vm167_vm0, %v502_v23  ;;  %v322_v25 = vpop.f32.mrb[1].mxu1  ;;  %361 = vst.msk [vmem:[%s622_s26] sm:$0xff] %vm167_vm0, %v282_v24 }
  0xe8   : > { %369 = vst.msk [vmem:[%s622_s26 + $0x40] sm:$0xff] %vm167_vm0, %v322_v25 }
  0xe9   : > { %v493_v26 = vpop.f32.mrb[2].mxu0 }
  0xea   : > { %v505_v27 = vpop.f32.mrb[2].mxu1  ;;  %364 = vst.msk [vmem:[%s622_s26 + $0x18] sm:$0xff] %vm167_vm0, %v493_v26  ;;  %v292_v28 = vpop.f32.mrb[3].mxu0 }
  0xeb   : > { %372 = vst.msk [vmem:[%s622_s26 + $0x58] sm:$0xff] %vm167_vm0, %v505_v27  ;;  %v332_v29 = vpop.f32.mrb[3].mxu1  ;;  %363 = vst.msk [vmem:[%s622_s26 + $0x10] sm:$0xff] %vm167_vm0, %v292_v28 }
  0xec   : > { %371 = vst.msk [vmem:[%s622_s26 + $0x50] sm:$0xff] %vm167_vm0, %v332_v29 }
  0xed   : > { %v496_v30 = vpop.f32.mrb[4].mxu0 }
  0xee   : > { %v508_v31 = vpop.f32.mrb[4].mxu1  ;;  %366 = vst.msk [vmem:[%s622_s26 + $0x28] sm:$0xff] %vm167_vm0, %v496_v30  ;;  %v302_v32 = vpop.f32.mrb[5].mxu0 }
  0xef   : > { %374 = vst.msk [vmem:[%s622_s26 + $0x68] sm:$0xff] %vm167_vm0, %v508_v31  ;;  %v342_v33 = vpop.f32.mrb[5].mxu1  ;;  %365 = vst.msk [vmem:[%s622_s26 + $0x20] sm:$0xff] %vm167_vm0, %v302_v32 }
  0xf0   : > { %373 = vst.msk [vmem:[%s622_s26 + $0x60] sm:$0xff] %vm167_vm0, %v342_v33 }
  0xf1   : > { %v499_v34 = vpop.f32.mrb[6].mxu0 }
  0xf2   : > { %v511_v35 = vpop.f32.mrb[6].mxu1  ;;  %368 = vst.msk [vmem:[%s622_s26 + $0x38] sm:$0xff] %vm167_vm0, %v499_v34  ;;  %v312_v36 = vpop.f32.mrb[7].mxu0 }
  0xf3   : > { %376 = vst.msk [vmem:[%s622_s26 + $0x78] sm:$0xff] %vm167_vm0, %v511_v35  ;;  %v352_v37 = vpop.f32.mrb[7].mxu1  ;;  %367 = vst.msk [vmem:[%s622_s26 + $0x30] sm:$0xff] %vm167_vm0, %v312_v36 }
  0xf4   : > { %375 = vst.msk [vmem:[%s622_s26 + $0x70] sm:$0xff] %vm167_vm0, %v352_v37 }
  0xf5 PF: > { %s12_s9 = sadd.s32 1, %s538_s9  }
  0xf6   : > { %p9_p4 = scmp.ge.s32.totalorder %s12_s9, 4  }
  0xf8   :  { %11 = sbr.rel (!%p9_p4) target bundleno = 1 (0x1), region = 58 }

</bundles_post_ra>
